<compile_context>
chip_gen: v7x
topology: tpu7x:2x2x1
jax: 0.10.0
libtpu: 0.0.40
codegen_flags: <defaults>
</compile_context>

<pallas_src>
import jax
import jax.numpy as jnp
from jax import lax
from jax.experimental import pallas as pl
from jax.experimental.pallas import tpu as pltpu


def gcn_kernel(a_ref, x_ref, w_ref, o_ref):
    # a_ref: (bb, N, N)        adjacency chunk (self-loops handled implicitly)
    # x_ref: (bb, N, Fin+1)    graph signal with a ones-column appended
    # w_ref: (Fin+1, Fout_pad) weight with the bias folded in as the last row,
    #                          zero-padded along lanes to a multiple of 128
    # o_ref: (bb, N, Fout_pad)
    a = a_ref[...]
    x = x_ref[...]

    # Degree of (A + I): the self-loop contributes exactly 1 to each row sum.
    deg = jnp.sum(a, axis=-1, keepdims=True) + 1.0        # (bb, N, 1)
    d = lax.rsqrt(deg)                                     # D^-1/2   (EUP)
    d2 = d * d

    # L @ X_aug = d ⊙ (A @ (d ⊙ X_aug)) + d² ⊙ X_aug
    sx = d * x                                             # (bb, N, Fin+1)
    ax = jnp.einsum("bij,bjf->bif", a, sx,
                    preferred_element_type=jnp.float32)    # MXU, contracts N
    lx = d * ax + d2 * x                                   # (bb, N, Fin+1)

    # (L @ [X | 1]) @ [[W],[b]]  ==  L @ (X @ W + b)
    bb, n, faug = lx.shape
    y = jnp.dot(lx.reshape(bb * n, faug), w_ref[...],
                preferred_element_type=jnp.float32)        # (bb*N, Fout_pad)
    o_ref[...] = y.reshape(bb, n, -1).astype(o_ref.dtype)


def gcn_layer(A, X, W_t, b, *, batch_block=None):
    """A: [B,N,N], X: [B,N,Fin], W_t: [Fin,Fout], b: [1,Fout] -> [B,N,Fout]."""
    B, N, _ = A.shape
    Fin = X.shape[-1]
    Fout = W_t.shape[-1]

    # ---- wrapper-side layout plumbing (cheap XLA ops outside the kernel) ----
    # Affine augmentation: ones column on X, bias row on W.
    X_aug = jnp.concatenate(
        [X, jnp.ones((B, N, 1), X.dtype)], axis=-1)                 # (B,N,Fin+1)
    W_aug = jnp.concatenate(
        [W_t, b.reshape(1, Fout).astype(W_t.dtype)], axis=0)        # (Fin+1,Fout)

    # Lane-dense output: pad Fout up to a multiple of 128 lanes.
    Fout_pad = ((Fout + 127) // 128) * 128
    if Fout_pad != Fout:
        W_aug = jnp.pad(W_aug, ((0, 0), (0, Fout_pad - Fout)))

    # Batch chunking: <=2 chunks -> low per-step overhead + 2-way parallel grid.
    if batch_block is None:
        batch_block = B if (B % 2 or B < 2) else B // 2
    assert B % batch_block == 0
    bb = batch_block
    num_chunks = B // bb
    Faug = Fin + 1

    cost = pl.CostEstimate(
        flops=int(2 * B * N * N * Faug + 2 * B * N * Faug * Fout_pad
                  + 6 * B * N * Faug),
        transcendentals=int(B * N),
        bytes_accessed=int(4 * (A.size + X_aug.size + W_aug.size
                                + B * N * Fout_pad)),
    )

    out_full = pl.pallas_call(
        gcn_kernel,
        out_shape=jax.ShapeDtypeStruct((B, N, Fout_pad), jnp.float32),
        grid=(num_chunks,),
        in_specs=[
            pl.BlockSpec((bb, N, N), lambda i: (i, 0, 0)),
            pl.BlockSpec((bb, N, Faug), lambda i: (i, 0, 0)),
            pl.BlockSpec((Faug, Fout_pad), lambda i: (0, 0)),
        ],
        out_specs=pl.BlockSpec((bb, N, Fout_pad), lambda i: (i, 0, 0)),
        compiler_params=pltpu.CompilerParams(
            dimension_semantics=("parallel",)),
        cost_estimate=cost,
    )(A, X_aug, W_aug)

    return out_full[:, :, :Fout]


def reference_gcn(A, X, W_t, b):
    a = A + jnp.eye(A.shape[-1], dtype=A.dtype)[None]
    d = jnp.power(a.sum(-1), -0.5)
    L = d[..., :, None] * a * d[..., None, :]
    x = X @ W_t + b
    return jnp.einsum("bij,bjf->bif", L, x)


if __name__ == "__main__":
    B, N, FIN, FOUT = 2, 16, 8, 32

    key = jax.random.PRNGKey(0)
    k_a, k_x, k_w, k_b = jax.random.split(key, 4)

    # create_adj: random 0/1 adjacency, zero diagonal
    a_raw = jax.random.uniform(k_a, (B, N, N), dtype=jnp.float32)
    A = jnp.where(a_raw > 0.5, 1.0, 0.0)
    A = A * (1.0 - jnp.eye(N, dtype=jnp.float32))[None]

    # graph signal
    X = jax.random.uniform(k_x, (B, N, FIN), dtype=jnp.float32)

    # nn.Linear(in_features=FIN, out_features=FOUT) params, stored transposed
    W_t = (jax.random.normal(k_w, (FIN, FOUT), dtype=jnp.float32)
           * (1.0 / jnp.sqrt(FIN)))
    b = jax.random.normal(k_b, (1, FOUT), dtype=jnp.float32) * 0.01

    out = gcn_layer(A, X, W_t, b)
    out = jax.block_until_ready(out)

    ref = reference_gcn(A, X, W_t, b)
    assert out.shape == (B, N, FOUT)
    assert jnp.allclose(out, ref, atol=1e-4, rtol=1e-4)

    print("KERNEL_OK")
</pallas_src>

<mosaic_0001>
module attributes {stable_mosaic.version = 11 : i64} {
  func.func @gcn_kernel(%arg0: i32, %arg1: memref<1x16x16xf32, #tpu.memory_space<vmem>>, %arg2: memref<1x16x9xf32, #tpu.memory_space<vmem>>, %arg3: memref<9x128xf32, #tpu.memory_space<vmem>>, %arg4: memref<1x16x128xf32, #tpu.memory_space<vmem>>) attributes {dimension_semantics = [#tpu.dimension_semantics<parallel>], iteration_bounds = array<i64: 2>, scalar_prefetch = 0 : i64, scratch_operands = 0 : i64, tpu.core_type = #tpu.core_type<tc>, window_params = [{transform_indices = @transform_0, window_bounds = array<i64: 1, 16, 16>}, {transform_indices = @transform_1, window_bounds = array<i64: 1, 16, 9>}, {pipeline_mode = #tpu.pipeline_mode<synchronous>, transform_indices = @transform_2, window_bounds = array<i64: 9, 128>}, {transform_indices = @transform_3, window_bounds = array<i64: 1, 16, 128>}]} {
    %c0 = arith.constant 0 : index
    %c0_0 = arith.constant 0 : index
    %c0_1 = arith.constant 0 : index
    %0 = vector.load %arg1[%c0, %c0_0, %c0_1] : memref<1x16x16xf32, #tpu.memory_space<vmem>>, vector<1x16x16xf32>
    %c0_2 = arith.constant 0 : index
    %c0_3 = arith.constant 0 : index
    %c0_4 = arith.constant 0 : index
    %1 = vector.load %arg2[%c0_2, %c0_3, %c0_4] : memref<1x16x9xf32, #tpu.memory_space<vmem>>, vector<1x16x9xf32>
    %cst = arith.constant dense<0.000000e+00> : vector<1x16xf32>
    %2 = vector.multi_reduction <add>, %0, %cst [2] : vector<1x16x16xf32> to vector<1x16xf32>
    %3 = vector.shape_cast %2 : vector<1x16xf32> to vector<1x16x1xf32>
    %cst_5 = arith.constant 1.000000e+00 : f32
    %4 = vector.broadcast %cst_5 : f32 to vector<1x16x1xf32>
    %5 = arith.addf %3, %4 : vector<1x16x1xf32>
    %6 = math.rsqrt %5 : vector<1x16x1xf32>
    %7 = arith.mulf %6, %6 : vector<1x16x1xf32>
    %8 = vector.broadcast %6 : vector<1x16x1xf32> to vector<1x16x9xf32>
    %9 = arith.mulf %8, %1 : vector<1x16x9xf32>
    "tpu.trace_start"() <{level = 10 : i32, message = "bij,bjf->bif"}> : () -> ()
    %cst_6 = arith.constant dense<0.000000e+00> : vector<1x16x9xf32>
    %10 = tpu.matmul %0, %9, %cst_6 {dimension_numbers = #tpu.dot_dimension_numbers<[2], [1], [1], [2], [0, 0, 0, 1, 1, 2], [0], [0]>} : vector<1x16x16xf32>, vector<1x16x9xf32>, vector<1x16x9xf32> -> vector<1x16x9xf32>
    "tpu.trace_stop"() : () -> ()
    %11 = vector.broadcast %6 : vector<1x16x1xf32> to vector<1x16x9xf32>
    %12 = arith.mulf %11, %10 : vector<1x16x9xf32>
    %13 = vector.broadcast %7 : vector<1x16x1xf32> to vector<1x16x9xf32>
    %14 = arith.mulf %13, %1 : vector<1x16x9xf32>
    %15 = arith.addf %12, %14 : vector<1x16x9xf32>
    %16 = vector.shape_cast %15 : vector<1x16x9xf32> to vector<16x9xf32>
    %c0_7 = arith.constant 0 : index
    %c0_8 = arith.constant 0 : index
    %17 = vector.load %arg3[%c0_7, %c0_8] : memref<9x128xf32, #tpu.memory_space<vmem>>, vector<9x128xf32>
    %cst_9 = arith.constant dense<0.000000e+00> : vector<16x128xf32>
    %18 = tpu.matmul %16, %17, %cst_9 {dimension_numbers = #tpu.dot_dimension_numbers<[1], [0], [0], [1], [0, 0, 1, 1], [], []>} : vector<16x9xf32>, vector<9x128xf32>, vector<16x128xf32> -> vector<16x128xf32>
    %19 = vector.shape_cast %18 : vector<16x128xf32> to vector<1x16x128xf32>
    %c0_10 = arith.constant 0 : index
    %c0_11 = arith.constant 0 : index
    %c0_12 = arith.constant 0 : index
    %20 = vector.load %arg4[%c0_10, %c0_11, %c0_12] : memref<1x16x128xf32, #tpu.memory_space<vmem>>, vector<1x16x128xf32>
    tpu.vector_store %arg4[%c0_10, %c0_11, %c0_12], %19 {strides = array<i32>} : memref<1x16x128xf32, #tpu.memory_space<vmem>>, vector<1x16x128xf32>,
    return
  }
  func.func @transform_0(%arg0: i32) -> (i32, i32, i32) {
    %c0_i32 = arith.constant 0 : i32
    %c0_i32_0 = arith.constant 0 : i32
    %c0_i32_1 = arith.constant 0 : i32
    return %arg0, %c0_i32, %c0_i32_0 : i32, i32, i32
  }
  func.func @transform_1(%arg0: i32) -> (i32, i32, i32) {
    %c0_i32 = arith.constant 0 : i32
    %c0_i32_0 = arith.constant 0 : i32
    %c0_i32_1 = arith.constant 0 : i32
    return %arg0, %c0_i32, %c0_i32_0 : i32, i32, i32
  }
  func.func @transform_2(%arg0: i32) -> (i32, i32) {
    %c0_i32 = arith.constant 0 : i32
    %c0_i32_0 = arith.constant 0 : i32
    %c0_i32_1 = arith.constant 0 : i32
    return %c0_i32, %c0_i32_0 : i32, i32
  }
  func.func @transform_3(%arg0: i32) -> (i32, i32, i32) {
    %c0_i32 = arith.constant 0 : i32
    %c0_i32_0 = arith.constant 0 : i32
    %c0_i32_1 = arith.constant 0 : i32
    return %arg0, %c0_i32, %c0_i32_0 : i32, i32, i32
  }
}

</mosaic_0001>

<bundles_post_ra>
// kernel: tpu_custom_call.1
= control target key start
LH: loop header
LB: loop body
LE: loop exit
PB: predicated region body
PF: predicated region fallthrough
CT: control target
= control target key end

     0   :  { %8 = vsyncpa [#allocation3], 0  ;;  %s777_s0 = inlined_call_operand.vmem [shape: f32[2,16,16], index: 0, kind: input, shape index: {}]   ;;  %s778_s1 = inlined_call_operand.vmem [shape: f32[2,16,9], index: 1, kind: input, shape index: {}]   ;;  %s779_s2 = inlined_call_operand.vmem [shape: f32[9,128], index: 2, kind: input, shape index: {}]   ;;  %s780_s3 = inlined_call_operand.hbm [shape: f32[2,16,128], index: 3, kind: output, shape index: {}]  }
   0x1   :  { %10 = vsyncpa [#allocation3 + $0x1], 0  ;;  %s661_s12 = smov 0   ;;  %s663_s13 = smov 0  }
   0x2   :  { %s665_s14 = smov 0   ;;  %s667_s15 = smov 0  }
   0x3 LB: > { %s682_s16 = sadd.s32 4294967295, %s635_s15   ;;  %s473_s17 = sadd.s32 4294967294, %s635_s15   ;;  %s635_s15 = sphi %s667_s15, %s786_s15   ;;  %s631_s14 = sphi %s665_s14, %s785_s14   ;;  %s627_s13 = sphi %s663_s13, %s784_s13   ;;  %s623_s12 = sphi %s661_s12, %s783_s12  }
   0x4   : > { %s686_s18 = sadd.s32 1, %s635_s15   ;;  %s96_s19 = sadd.s32 1, %s631_s14 }
   0x5   : > { %s93_s20 = ssub.s32 %s635_s15, %s686_s18  ;;  %p106_p0 = scmp.ne.s32.totalorder %s631_s14, %s627_s13 }
   0x6   : > { %p94_p1 = scmp.eq.s32.totalorder %s93_s20, 0  ;;  %p107_p2 = scmp.eq.s32.totalorder %s682_s16, 1 }
   0x7   : > { %p112_p3 = scmp.ne.s32.totalorder %s627_s13, %s623_s12  ;;  %p113_p4 = scmp.eq.s32.totalorder %s473_s17, 1 }
   0x8   : > { %s697_s21 = scalar_select %p94_p1, %s631_s14, %s96_s19  }
   0x9   : > { %p699_p5 = por %p107_p2, %p106_p0  ;;  %p703_p6 = por %p113_p4, %p112_p3 }
   0xa   : > { %p476_p7 = scmp.ge.s32.totalorder %s635_s15, 1  ;;  %p150_p8 = scmp.lt.s32.totalorder %s635_s15, 3 }
   0xc   : > { %p151_p9 = pnand %p476_p7, %p150_p8 }
   0xd   : > { %p179_p10 = scmp.lt.s32.totalorder (!%p151_p9), %s682_s16, 1  ;;  %vm193_vm0 = vcmask (!%p151_p9), 130048   ;;  %v295_v15 = vld [vmem:[%s779_s2] sm:$0xff] (!%p151_p9)  ;;  %v296_v16 = vld [vmem:[%s779_s2 + $0x8] sm:$0x1] (!%p151_p9)  ;;  %vm304_vm1 = vcmask (!%p151_p9), 1040384  }
   0xe   : > { %154 = sbr.rel (%p151_p9) target bundleno = 640 (0x280), region = 32  ;;  %v521_v17 = vpack.c.bf16 (!%p151_p9), %v296_v16, %v295_v15  ;;  %vm637_vm2 = vmmov (!%p151_p9), 1   ;;  %vm297_vm4 = vcmask (!%p151_p9), 72704   ;;  %s176_s9 = sand.u32 (!%p151_p9), 1, %s627_s13  }
   0xf   : > { %vm522_vm3 = vmpackc.low (!%p151_p9), %vm304_vm1, %vm637_vm2  ;;  %s477_s10 = sshll.u32 (!%p151_p9), %s176_s9, 4  ;;  %s494_s19 = sshll.u32 (!%p151_p9), %s682_s16, 8 }
  0x10   : > { %523 = vmatprep.subr.msk.bf16.mxu1 (!%p151_p9), %vm522_vm3, %v521_v17  ;;  %s178_s11 = scalar_lea.vmem (!%p151_p9), [#allocation2], %s477_s10  ;;  %s736_s26 = scalar_lea.sflag (!%p151_p9), [#allocation3], %s176_s9 }
  0x11   : > { %526 = vmatpush3.bf16.msk.msra.mxu1 (!%p151_p9), %vm522_vm3, %v521_v17  ;;  %s399_s17 = sshll.u32 (!%p151_p9), %s178_s11, 4  ;;  %s729_s17 = int_to_ptr.vmem [resolvable:$true] %s399_s17 }
  0x12   : > { %s573_s27 = scalar_lea.vmem (!%p151_p9), %s729_s17, 256 }
  0x13   : > { %p574_p11 = scmp.ne.s32.totalorder (!%p151_p9), %s729_s17, %s573_s27 }
  0x15   : > { %s180_s24 = scalar_select %p179_p10, %s682_s16, 1 }
  0x16   : > { %p575_p12 = pnand %p574_p11, %p699_p5  ;;  %s638_s16 = smov [#allocation2]  }
  0x17   : > { %s492_s25 = sshll.u32 %s180_s24, 4 }
  0x18   : > { %s183_s28 = scalar_lea.vmem %s777_s0, %s492_s25  ;;  %s188_s4 = scalar_lea.vmem %s778_s1, %s492_s25 }
  0x19   : > { %v189_v0 = vld [vmem:[%s183_s28] sm:$0xff]  ;;  %v190_v1 = vld [vmem:[%s183_s28 + $0x8] sm:$0xff]  ;;  %s734_s25 = scalar_lea.hbm %s780_s3, %s494_s19  ;;  %p576_p13 = pneg %p575_p12 }
  0x1a   : > { %v194_v2 = vsel %vm193_vm0, %v189_v0, 0.0  ;;  %507 = vmatprep.mubr.msk.f32.mxu0 %vm193_vm0, %v189_v0  ;;  %v197_v3 = vsel %vm193_vm0, %v190_v1, 0.0  ;;  %v191_v9 = vld [vmem:[%s188_s4] sm:$0xff]  ;;  %v192_v10 = vld [vmem:[%s188_s4 + $0x8] sm:$0xff]  ;;  %s577_s28 = sshll.u32 %s638_s16, 4  ;;  %s578_s28 = int_to_ptr.vmem [resolvable:$false] %s577_s28 }
  0x1b   : > { %195 = vadd.xlane.f32.xlu0 %v194_v2  ;;  %s579_s29 = scalar_lea.vmem %s578_s28, 512  ;;  %p580_p0 = scmp.lt.s32.totalorder %s729_s17, %s578_s28 }
  0x1c   : > { %p581_p1 = scmp.lt.s32.totalorder %s579_s29, %s573_s27 }
  0x1e   : > { %p582_p2 = por %p581_p1, %p580_p0 }
  0x1f   : > { %198 = vadd.xlane.f32.xlu0 %v197_v3 }
  0x20   : > { %p583_p3 = pnand %p582_p2, %p576_p13 }
  0xa8   : > { %v196_v4 = vpop.xlane.xlu0 %195 }
  0xa9   : > { %v200_v5 = vadd.f32 1.0, %v196_v4 }
  0xab   : > { %569 = vrsqrt.f32 %v200_v5 }
  0xac   : > { %v199_v6 = vpop.xlane.xlu0 %198 }
  0xad   : > { %v201_v7 = vadd.f32 1.0, %v199_v6 }
  0xaf   : > { %571 = vrsqrt.f32 %v201_v7 }
  0xb5   : > { %v570_v8 = vpop.eup %569 }
  0xb6   : > { %v206_v12 = vmul.f32 %v570_v8, %v191_v9  ;;  %v204_v19 = vmul.f32 %v570_v8, %v570_v8 }
  0xb8   : > { %v291_v25 = vmul.f32 %v204_v19, %v191_v9 }
  0xb9   : > { %v572_v11 = vpop.eup %571 }
  0xba   : > { %v207_v13 = vmul.f32 %v572_v11, %v192_v10  ;;  %v205_v18 = vmul.f32 %v572_v11, %v572_v11 }
  0xbc   : > { %v517_v14 = vpack.c.bf16 %v207_v13, %v206_v12  ;;  %v292_v22 = vmul.f32 %v205_v18, %v192_v10 }
  0xbe   : > { %518 = vmatprep.subr.bf16.mxu0 %v517_v14 }
  0xbf   : > { %520 = vmatpush3.bf16.msra.mxu0 %v517_v14 }
  0xc2   : > { %508 = vmatmul.mubr.msk.f32.vlgmr.msra.gmra.mrb[0].mxu0 %vm193_vm0, %v190_v1 }
 0x195   : > { %v509_v20 = vpop.f32.mrb[0].mxu0 }
 0x196   : > { %v290_v21 = vmul.f32 %v572_v11, %v509_v20  ;;  %v280_v23 = vpop.f32.mrb[1].mxu0 }
 0x197   : > { %v289_v24 = vmul.f32 %v570_v8, %v280_v23 }
 0x198   : > { %v294_v26 = vadd.f32 %v292_v22, %v290_v21 }
 0x199   : > { %v293_v27 = vadd.f32 %v291_v25, %v289_v24 }
 0x19b   : > { %514 = vmatprep.mubr.msk.f32.mxu1 %vm297_vm4, %v293_v27 }
 0x19c   : > { %515 = vmatmul.mubr.msk.f32.vlgmr.msra.gmra.mrb[0].mxu1 %vm297_vm4, %v294_v26 }
 0x26f   : > { %v516_v28 = vpop.f32.mrb[0].mxu1 }
 0x270   : > { %384 = vst [vmem:[%s178_s11 + $0x8] sm:$0xff] %v516_v28  ;;  %v374_v29 = vpop.f32.mrb[1].mxu1 }
 0x271   : > { %383 = vst [vmem:[%s178_s11] sm:$0xff] %v374_v29 }
 0x272   : > { %586 = shalt.err (!%p583_p3)
}
 0x273   : > { %s587_s30 = scalar_lea.hbm %s734_s25, 256  ;;  %s591_s6 = scalar_lea.hbm %s780_s3, 512 }
 0x274   : > { %p588_p4 = scmp.ne.s32.totalorder %s734_s25, %s587_s30  ;;  %p592_p9 = scmp.lt.u32.totalorder %s734_s25, %s780_s3 }
 0x275   : > { %p593_p10 = scmp.lt.u32.totalorder %s591_s6, %s587_s30  ;;  %p595_p12 = scmp.lt.u32.totalorder %s587_s30, %s734_s25 }
 0x276   : > { %p589_p7 = pnand %p588_p4, %p699_p5 }
 0x277   : > { %p594_p11 = por %p593_p10, %p592_p9 }
 0x278   : > { %p590_p8 = pneg %p589_p7 }
 0x279   : > { %p596_p13 = por %p595_p12, %p594_p11 }
 0x27b   : > { %p597_p0 = pnand %p596_p13, %p590_p8 }
 0x27d   : > { %600 = shalt.err (!%p597_p0)
}
 0x27e   : > { %s639_s9 = smov 128   ;;  %s640_s10 = smov 8  }
 0x27f   : > { %527 = dma.vmem_to_hbm [thread:$0]  (%p699_p5), %s729_s17, 256, %s734_s25, %s736_s26, %s639_s9, %s639_s9, %s640_s10  }
 0x280 PF: > { %p533_p1 = scmp.ge.s32.totalorder %s635_s15, 2  ;;  %s414_s11 = sand.u32 1, %s623_s12  }
 0x281   : > { %s415_s19 = scalar_lea.sflag [#allocation3], %s414_s11 }
 0x282   : > { %p530_p2 = pnand %p533_p1, %p703_p6 }
 0x284   : > { %618 = dma.done.wait (!%p530_p2), %s415_s19, 256  }
 0x285   : > { %620 = vsyncadd (!%p530_p2), %s415_s19, 4294967040  ;;  %p13_p3 = scmp.ge.s32.totalorder %s686_s18, 4   ;;  %s783_s12 = smov %s627_s13 }
 0x286   : > { %s784_s13 = smov %s631_s14  ;;  %s785_s14 = smov %s697_s21 }
 0x287   : > { %s786_s15 = smov %s686_s18  ;;  %15 = sbr.rel (!%p13_p3) target bundleno = 3 (0x3), region = 70 }
 0x28e   :  { %420 = vsyncpa [#allocation3], 1 }
 0x28f   :  { %422 = vsyncpa [#allocation3 + $0x1], 1 }

</bundles_post_ra>
